<compile_context>
chip_gen: v5e
topology: v5e:2x2
jax: 0.10.0
libtpu: 0.0.40
codegen_flags: <defaults>
</compile_context>

<pallas_src>
import functools

import jax
import jax.numpy as jnp
from jax.experimental import pallas as pl
from jax.experimental.pallas import tpu as pltpu

EPS = 1e-5
_VMEM_LIMIT = 32 * 1024 * 1024  # bytes; modest, safe on v5e/v6e/v7x


def _pick_hw_tile(hw, c, max_block_bytes=2 * 1024 * 1024):
    """Largest multiple-of-128 divisor of hw such that a (c, hw_tile) f32 block
    stays under max_block_bytes; falls back to the full extent (always legal)."""
    if hw % 128 != 0:
        return hw
    max_lanes = max(128, (max_block_bytes // (4 * c)) // 128 * 128)
    if hw <= max_lanes:
        return hw
    t = max_lanes
    while t >= 128:
        if hw % t == 0:
            return t
        t -= 128
    return hw


def _stats_kernel(gamma_ref, beta_ref, x_ref, ss_ref, acc_ref, *, inv_count, eps):
    # gamma_ref/beta_ref: (1, C, 1) f32; x_ref: (1, C, hw_tile)
    # ss_ref (output):    (2, C, 1) f32  -> row 0 = scale, row 1 = shift
    # acc_ref (scratch):  (2, C, 1) f32  -> row 0 = sum,   row 1 = sumsq
    i = pl.program_id(0)
    j = pl.program_id(1)

    @pl.when(jnp.logical_and(i == 0, j == 0))
    def _():
        acc_ref[...] = jnp.zeros_like(acc_ref)

    x = x_ref[...].astype(jnp.float32)                              # (1, C, hw_tile)
    acc_ref[0:1, :, :] += jnp.sum(x, axis=2, keepdims=True)         # partial sum
    acc_ref[1:2, :, :] += jnp.sum(x * x, axis=2, keepdims=True)     # partial sumsq

    last = jnp.logical_and(i == pl.num_programs(0) - 1,
                           j == pl.num_programs(1) - 1)

    @pl.when(last)
    def _():
        mean = acc_ref[0:1, :, :] * inv_count                       # (1, C, 1)
        var = acc_ref[1:2, :, :] * inv_count - mean * mean          # biased var
        inv_std = jax.lax.rsqrt(var + eps)
        scale = gamma_ref[...] * inv_std
        ss_ref[0:1, :, :] = scale
        ss_ref[1:2, :, :] = beta_ref[...] - mean * scale


def _apply_kernel(scale_ref, shift_ref, x_ref, o_ref):
    # scale_ref/shift_ref: (1, C, 1); x_ref/o_ref: (1, C, hw_tile)
    x = x_ref[...].astype(jnp.float32)
    y = x * scale_ref[...] + shift_ref[...]       # (1,C,1) broadcast along lanes
    o_ref[...] = jnp.maximum(y, 0.0).astype(o_ref.dtype)


def batch_norm_relu(x_nchw, gamma, beta, eps=EPS):
    """x_nchw: (N, C, H, W); gamma/beta: (C,). Returns relu(batch_norm(x))."""
    n, c, h, w = x_nchw.shape
    hw = h * w
    x3d = x_nchw.reshape(n, c, hw)                 # free reshape, no transpose
    g3 = gamma.reshape(1, c, 1).astype(jnp.float32)
    b3 = beta.reshape(1, c, 1).astype(jnp.float32)

    hw_tile = _pick_hw_tile(hw, c)
    grid = (n, hw // hw_tile)
    inv_count = 1.0 / float(n * hw)

    x_spec = pl.BlockSpec((1, c, hw_tile), lambda i, j: (i, 0, j))
    vec_spec = pl.BlockSpec((1, c, 1), lambda i, j: (0, 0, 0))

    # Pass 1: per-channel sum / sumsq -> folded (scale, shift), shape (2, C, 1).
    ss = pl.pallas_call(
        functools.partial(_stats_kernel, inv_count=inv_count, eps=eps),
        out_shape=jax.ShapeDtypeStruct((2, c, 1), jnp.float32),
        grid=grid,
        in_specs=[vec_spec, vec_spec, x_spec],
        out_specs=pl.BlockSpec((2, c, 1), lambda i, j: (0, 0, 0)),
        scratch_shapes=[pltpu.VMEM((2, c, 1), jnp.float32)],
        compiler_params=pltpu.CompilerParams(
            dimension_semantics=("arbitrary", "arbitrary"),
            vmem_limit_bytes=_VMEM_LIMIT),
    )(g3, b3, x3d)

    scale3 = ss[0:1]                               # (1, C, 1)
    shift3 = ss[1:2]                               # (1, C, 1)

    # Pass 2: tiled, lane-dense elementwise normalize + ReLU.
    out3d = pl.pallas_call(
        _apply_kernel,
        out_shape=jax.ShapeDtypeStruct((n, c, hw), x_nchw.dtype),
        grid=grid,
        in_specs=[vec_spec, vec_spec, x_spec],
        out_specs=x_spec,
        compiler_params=pltpu.CompilerParams(
            dimension_semantics=("parallel", "parallel"),
            vmem_limit_bytes=_VMEM_LIMIT),
    )(scale3, shift3, x3d)

    return out3d.reshape(n, c, h, w)


def _reference(x_nchw, gamma, beta, eps=EPS):
    mean = jnp.mean(x_nchw, axis=(0, 2, 3), keepdims=True)
    var = jnp.mean((x_nchw - mean) ** 2, axis=(0, 2, 3), keepdims=True)
    y = (x_nchw - mean) * jax.lax.rsqrt(var + eps)
    y = y * gamma.reshape(1, -1, 1, 1) + beta.reshape(1, -1, 1, 1)
    return jnp.maximum(y, 0.0)


if __name__ == "__main__":
    key = jax.random.PRNGKey(0)
    kx, kg, kb = jax.random.split(key, 3)

    N, C, H, W = 2, 4, 16, 16
    x = jax.random.normal(kx, (N, C, H, W), dtype=jnp.float32) * 2.0 + 0.5
    # PyTorch default is gamma=1, beta=0; use non-trivial values to exercise
    # the affine path.
    gamma = 1.0 + 0.1 * jax.random.normal(kg, (C,), dtype=jnp.float32)
    beta = 0.1 * jax.random.normal(kb, (C,), dtype=jnp.float32)

    out = batch_norm_relu(x, gamma, beta)
    out = jax.block_until_ready(out)

    ref = _reference(x, gamma, beta)
    assert out.shape == (N, C, H, W)
    assert jnp.allclose(out, ref, atol=1e-4, rtol=1e-4), \
        float(jnp.max(jnp.abs(out - ref)))

    print("KERNEL_OK")
</pallas_src>

<mosaic_0001>
module attributes {stable_mosaic.version = 11 : i64} {
  func.func @_stats_kernel(%arg0: i32, %arg1: i32, %arg2: memref<1x4x1xf32, #tpu.memory_space<vmem>>, %arg3: memref<1x4x1xf32, #tpu.memory_space<vmem>>, %arg4: memref<1x4x256xf32, #tpu.memory_space<vmem>>, %arg5: memref<2x4x1xf32, #tpu.memory_space<vmem>>, %arg6: memref<2x4x1xf32, #tpu.memory_space<vmem>>) attributes {dimension_semantics = [#tpu.dimension_semantics<arbitrary>, #tpu.dimension_semantics<arbitrary>], iteration_bounds = array<i64: 2, 1>, scalar_prefetch = 0 : i64, scratch_operands = 1 : i64, tpu.core_type = #tpu.core_type<tc>, window_params = [{pipeline_mode = #tpu.pipeline_mode<synchronous>, transform_indices = @transform_0, window_bounds = array<i64: 1, 4, 1>}, {pipeline_mode = #tpu.pipeline_mode<synchronous>, transform_indices = @transform_1, window_bounds = array<i64: 1, 4, 1>}, {transform_indices = @transform_2, window_bounds = array<i64: 1, 4, 256>}, {pipeline_mode = #tpu.pipeline_mode<synchronous>, transform_indices = @transform_3, window_bounds = array<i64: 2, 4, 1>}]} {
    %c0_i32 = arith.constant 0 : i32
    %0 = arith.cmpi eq, %arg0, %c0_i32 : i32
    %c0_i32_0 = arith.constant 0 : i32
    %1 = arith.cmpi eq, %arg1, %c0_i32_0 : i32
    %2 = arith.andi %0, %1 : i1
    %3 = arith.extui %2 : i1 to i32
    %c0_i32_1 = arith.constant 0 : i32
    %4 = arith.cmpi ne, %3, %c0_i32_1 : i32
    scf.if %4 {
      %cst_18 = arith.constant 0.000000e+00 : f32
      %22 = vector.broadcast %cst_18 : f32 to vector<2x4x1xf32>
      %c0_19 = arith.constant 0 : index
      %c0_20 = arith.constant 0 : index
      %c0_21 = arith.constant 0 : index
      %23 = vector.load %arg6[%c0_19, %c0_20, %c0_21] : memref<2x4x1xf32, #tpu.memory_space<vmem>>, vector<2x4x1xf32>
      tpu.vector_store %arg6[%c0_19, %c0_20, %c0_21], %22 {strides = array<i32>} : memref<2x4x1xf32, #tpu.memory_space<vmem>>, vector<2x4x1xf32>,
    } else {
    }
    %c0 = arith.constant 0 : index
    %c0_2 = arith.constant 0 : index
    %c0_3 = arith.constant 0 : index
    %5 = vector.load %arg4[%c0, %c0_2, %c0_3] : memref<1x4x256xf32, #tpu.memory_space<vmem>>, vector<1x4x256xf32>
    %c0_4 = arith.constant 0 : index
    %c0_5 = arith.constant 0 : index
    %c0_6 = arith.constant 0 : index
    %6 = vector.load %arg6[%c0_4, %c0_5, %c0_6] : memref<2x4x1xf32, #tpu.memory_space<vmem>>, vector<1x4x1xf32>
    %cst = arith.constant dense<0.000000e+00> : vector<1x4xf32>
    %7 = vector.multi_reduction <add>, %5, %cst [2] : vector<1x4x256xf32> to vector<1x4xf32>
    %8 = vector.shape_cast %7 : vector<1x4xf32> to vector<1x4x1xf32>
    %9 = arith.addf %6, %8 : vector<1x4x1xf32>
    %c0_7 = arith.constant 0 : index
    %c0_8 = arith.constant 0 : index
    %c0_9 = arith.constant 0 : index
    %10 = vector.load %arg6[%c0_7, %c0_8, %c0_9] : memref<2x4x1xf32, #tpu.memory_space<vmem>>, vector<1x4x1xf32>
    tpu.vector_store %arg6[%c0_7, %c0_8, %c0_9], %9 {strides = array<i32>} : memref<2x4x1xf32, #tpu.memory_space<vmem>>, vector<1x4x1xf32>,
    %c1 = arith.constant 1 : index
    %c0_10 = arith.constant 0 : index
    %c0_11 = arith.constant 0 : index
    %11 = vector.load %arg6[%c1, %c0_10, %c0_11] : memref<2x4x1xf32, #tpu.memory_space<vmem>>, vector<1x4x1xf32>
    %12 = arith.mulf %5, %5 : vector<1x4x256xf32>
    %cst_12 = arith.constant dense<0.000000e+00> : vector<1x4xf32>
    %13 = vector.multi_reduction <add>, %12, %cst_12 [2] : vector<1x4x256xf32> to vector<1x4xf32>
    %14 = vector.shape_cast %13 : vector<1x4xf32> to vector<1x4x1xf32>
    %15 = arith.addf %11, %14 : vector<1x4x1xf32>
    %c1_13 = arith.constant 1 : index
    %c0_14 = arith.constant 0 : index
    %c0_15 = arith.constant 0 : index
    %16 = vector.load %arg6[%c1_13, %c0_14, %c0_15] : memref<2x4x1xf32, #tpu.memory_space<vmem>>, vector<1x4x1xf32>
    tpu.vector_store %arg6[%c1_13, %c0_14, %c0_15], %15 {strides = array<i32>} : memref<2x4x1xf32, #tpu.memory_space<vmem>>, vector<1x4x1xf32>,
    %c1_i32 = arith.constant 1 : i32
    %17 = arith.cmpi eq, %arg0, %c1_i32 : i32
    %c0_i32_16 = arith.constant 0 : i32
    %18 = arith.cmpi eq, %arg1, %c0_i32_16 : i32
    %19 = arith.andi %17, %18 : i1
    %20 = arith.extui %19 : i1 to i32
    %c0_i32_17 = arith.constant 0 : i32
    %21 = arith.cmpi ne, %20, %c0_i32_17 : i32
    scf.if %21 {
      %c0_18 = arith.constant 0 : index
      %c0_19 = arith.constant 0 : index
      %c0_20 = arith.constant 0 : index
      %22 = vector.load %arg6[%c0_18, %c0_19, %c0_20] : memref<2x4x1xf32, #tpu.memory_space<vmem>>, vector<1x4x1xf32>
      %cst_21 = arith.constant 0.001953125 : f32
      %23 = vector.broadcast %cst_21 : f32 to vector<1x4x1xf32>
      %24 = arith.mulf %22, %23 : vector<1x4x1xf32>
      %c1_22 = arith.constant 1 : index
      %c0_23 = arith.constant 0 : index
      %c0_24 = arith.constant 0 : index
      %25 = vector.load %arg6[%c1_22, %c0_23, %c0_24] : memref<2x4x1xf32, #tpu.memory_space<vmem>>, vector<1x4x1xf32>
      %cst_25 = arith.constant 0.001953125 : f32
      %26 = vector.broadcast %cst_25 : f32 to vector<1x4x1xf32>
      %27 = arith.mulf %25, %26 : vector<1x4x1xf32>
      %28 = arith.mulf %24, %24 : vector<1x4x1xf32>
      %29 = arith.subf %27, %28 : vector<1x4x1xf32>
      %cst_26 = arith.constant 9.99999974E-6 : f32
      %30 = vector.broadcast %cst_26 : f32 to vector<1x4x1xf32>
      %31 = arith.addf %29, %30 : vector<1x4x1xf32>
      %32 = math.rsqrt %31 : vector<1x4x1xf32>
      %c0_27 = arith.constant 0 : index
      %c0_28 = arith.constant 0 : index
      %c0_29 = arith.constant 0 : index
      %33 = vector.load %arg2[%c0_27, %c0_28, %c0_29] : memref<1x4x1xf32, #tpu.memory_space<vmem>>, vector<1x4x1xf32>
      %34 = arith.mulf %33, %32 : vector<1x4x1xf32>
      %c0_30 = arith.constant 0 : index
      %c0_31 = arith.constant 0 : index
      %c0_32 = arith.constant 0 : index
      %35 = vector.load %arg5[%c0_30, %c0_31, %c0_32] : memref<2x4x1xf32, #tpu.memory_space<vmem>>, vector<1x4x1xf32>
      tpu.vector_store %arg5[%c0_30, %c0_31, %c0_32], %34 {strides = array<i32>} : memref<2x4x1xf32, #tpu.memory_space<vmem>>, vector<1x4x1xf32>,
      %c0_33 = arith.constant 0 : index
      %c0_34 = arith.constant 0 : index
      %c0_35 = arith.constant 0 : index
      %36 = vector.load %arg3[%c0_33, %c0_34, %c0_35] : memref<1x4x1xf32, #tpu.memory_space<vmem>>, vector<1x4x1xf32>
      %37 = arith.mulf %24, %34 : vector<1x4x1xf32>
      %38 = arith.subf %36, %37 : vector<1x4x1xf32>
      %c1_36 = arith.constant 1 : index
      %c0_37 = arith.constant 0 : index
      %c0_38 = arith.constant 0 : index
      %39 = vector.load %arg5[%c1_36, %c0_37, %c0_38] : memref<2x4x1xf32, #tpu.memory_space<vmem>>, vector<1x4x1xf32>
      tpu.vector_store %arg5[%c1_36, %c0_37, %c0_38], %38 {strides = array<i32>} : memref<2x4x1xf32, #tpu.memory_space<vmem>>, vector<1x4x1xf32>,
    } else {
    }
    return
  }
  func.func @transform_0(%arg0: i32, %arg1: i32) -> (i32, i32, i32) {
    %c0_i32 = arith.constant 0 : i32
    %c0_i32_0 = arith.constant 0 : i32
    %c0_i32_1 = arith.constant 0 : i32
    %c0_i32_2 = arith.constant 0 : i32
    return %c0_i32, %c0_i32_0, %c0_i32_1 : i32, i32, i32
  }
  func.func @transform_1(%arg0: i32, %arg1: i32) -> (i32, i32, i32) {
    %c0_i32 = arith.constant 0 : i32
    %c0_i32_0 = arith.constant 0 : i32
    %c0_i32_1 = arith.constant 0 : i32
    %c0_i32_2 = arith.constant 0 : i32
    return %c0_i32, %c0_i32_0, %c0_i32_1 : i32, i32, i32
  }
  func.func @transform_2(%arg0: i32, %arg1: i32) -> (i32, i32, i32) {
    %c0_i32 = arith.constant 0 : i32
    %c0_i32_0 = arith.constant 0 : i32
    return %arg0, %c0_i32, %arg1 : i32, i32, i32
  }
  func.func @transform_3(%arg0: i32, %arg1: i32) -> (i32, i32, i32) {
    %c0_i32 = arith.constant 0 : i32
    %c0_i32_0 = arith.constant 0 : i32
    %c0_i32_1 = arith.constant 0 : i32
    %c0_i32_2 = arith.constant 0 : i32
    return %c0_i32, %c0_i32_0, %c0_i32_1 : i32, i32, i32
  }
}

</mosaic_0001>

<bundles_post_ra>
// kernel: tpu_custom_call.1
= control target key start
LH: loop header
LB: loop body
LE: loop exit
PB: predicated region body
PF: predicated region fallthrough
CT: control target
= control target key end

     0   :  { %8 = vsyncpa [#allocation4], 0  ;;  %s596_s0 = inlined_call_operand.vmem [shape: f32[1,4,1], index: 0, kind: input, shape index: {}]   ;;  %s597_s1 = inlined_call_operand.vmem [shape: f32[1,4,1], index: 1, kind: input, shape index: {}]   ;;  %s598_s2 = inlined_call_operand.hbm [shape: f32[2,4,256], index: 2, kind: input, shape index: {}]   ;;  %s599_s3 = inlined_call_operand.vmem [shape: f32[2,4,1], index: 3, kind: output, shape index: {}]  }
   0x1   :  { %10 = vsyncpa [#allocation4 + $0x1], 0  ;;  %s493_s12 = smov 0   ;;  %s495_s13 = smov 0  }
   0x2   :  { %s497_s14 = smov 0   ;;  %s499_s15 = smov 0  }
   0x3   :  { %s501_s16 = smov 0   ;;  %s503_s17 = smov 0  }
   0x4 LB: > { %s316_s18 = sadd.s32 4294967295, %s470_s17   ;;  %s28_s19 = sadd.s32 1, %s466_s16  ;;  %s470_s17 = sphi %s503_s17, %s16_s17   ;;  %s466_s16 = sphi %s501_s16, %s606_s16   ;;  %s462_s15 = sphi %s499_s15, %s605_s15   ;;  %s458_s14 = sphi %s497_s14, %s604_s14   ;;  %s454_s13 = sphi %s495_s13, %s603_s13   ;;  %s450_s12 = sphi %s493_s12, %s602_s12  }
   0x5   : > { %p30_p0 = scmp.ge.s32.totalorder %s28_s19, 2  ;;  %s79_s20 = sadd.s32 1, %s458_s14 }
   0x6   : > { %p86_p1 = scmp.ne.s32.totalorder %s458_s14, %s454_s13  ;;  %p87_p2 = scmp.eq.s32.totalorder %s470_s17, 0 }
   0x7   : > { %s608_s19 = smov (%p30_p0, %s28_s19), 0  ;;  %p92_p4 = scmp.ne.s32.totalorder %s454_s13, %s450_s12 }
   0x8   : > { %p529_p3 = por %p87_p2, %p86_p1  ;;  %s74_s22 = ssub.s32 %s466_s16, %s608_s19 }
   0x9   : > { %p93_p5 = scmp.eq.s32.totalorder %s316_s18, 0  ;;  %p77_p6 = scmp.eq.s32.totalorder %s74_s22, 0 }
   0xa   : > { %p338_p8 = scmp.lt.s32.totalorder %s470_s17, 2  ;;  %s143_s25 = sand.u32 1, %s458_s14  }
   0xb   : > { %p536_p7 = por %p93_p5, %p92_p4  ;;  %s329_s26 = sshll.u32 %s466_s16, 3 }
   0xc   : > { %s542_s24 = scalar_select %p77_p6, %s458_s14, %s79_s20  }
   0xd   : > { %s319_s27 = sshll.u32 %s143_s25, 3  ;;  %s154_s30 = scalar_lea.hbm %s598_s2, %s329_s26 }
   0xe   : > { %s156_s4 = sshll.u32 %s154_s30, 4  ;;  %s147_s5 = scalar_lea.vmem [#allocation3], %s319_s27  ;;  %s157_s4 = int_to_ptr.hbm [resolvable:$true] %s156_s4 }
   0xf   : > { %s158_s6 = sshll.u32 %s147_s5, 4  ;;  %p335_p9 = pnand %p338_p8, %p529_p3  ;;  %s159_s6 = int_to_ptr.vmem [resolvable:$true] %s158_s6 }
  0x10   : > { %p322_p10 = scmp.ge.s32.totalorder %s470_s17, 1  ;;  %p163_p11 = scmp.lt.s32.totalorder %s470_s17, 3 }
  0x11   : > { %s144_s7 = scalar_lea.sflag [#allocation4], %s143_s25 }
  0x12   : > { %337 = dma.hbm_to_vmem [thread:$0]  (!%p335_p9), %s157_s4, 128, %s159_s6, %s144_s7  }
  0x13   : > { %p164_p12 = pnand %p322_p10, %p163_p11 }
  0x14   : > { %s169_s8 = sand.u32 (!%p164_p12), 1, %s454_s13  }
  0x15   : > { %167 = sbr.rel (%p164_p12) target bundleno = 211 (0xd3), region = 32  ;;  %s323_s9 = sshll.u32 (!%p164_p12), %s169_s8, 3 }
  0x16   : > { %s170_s10 = scalar_lea.sflag (!%p164_p12), [#allocation4], %s169_s8  ;;  %s173_s11 = scalar_lea.vmem (!%p164_p12), [#allocation3], %s323_s9 }
  0x1a   : > { %445 = dma.done.wait (%p536_p7), %s170_s10, 128  }
  0x1b   : > { %447 = vsyncadd (%p536_p7), %s170_s10, 4294967168  ;;  %p193_p13 = scmp.eq.s32.totalorder %s462_s15, 0 }
  0x1c   : > { %vm199_vm0 = vcmask (%p193_p13), 3072   ;;  %v472_v0 = vmov (%p193_p13), 0.0  }
  0x1d   : > { %198 = sbr.rel (!%p193_p13) target bundleno = 34 (0x22), region = 40  ;;  %200 = vst.msk [vmem:[#allocation2] sm:$0xf] (%p193_p13), %vm199_vm0, %v472_v0 }
  0x1e   : > { %201 = vst.msk [vmem:[#allocation2 + $0x4] sm:$0xf] (%p193_p13), %vm199_vm0, %v472_v0 }
  0x22 PF: > { %v202_v1 = vld [vmem:[%s173_s11] sm:$0xff]  ;;  %vm210_vm1 = vcmask 1043456   ;;  %p235_p0 = scmp.eq.s32.totalorder %s462_s15, 1  ;;  %vm217_vm2 = vcmask 3072  }
  0x23   : > { %205 = vst [vmem:[#allocation1] ss:$2 sm:$0xff] %v202_v1  ;;  %v221_v2 = vmul.f32 %v202_v1, %v202_v1  ;;  %v257_v32 = vld [vmem:[%s596_s0] sm:$0xf] (%p235_p0) }
  0x24   : > { %v203_v13 = vld [vmem:[#allocation2] sm:$0xf]  ;;  %v260_v35 = vld [vmem:[%s597_s1] sm:$0xf] (%p235_p0) }
  0x25   : > { %v220_v16 = vld [vmem:[#allocation2 + $0x4] sm:$0xf] }
  0x2a   : > { %v206_v3 = vld.sshfl [vmem:[#allocation1] sm:$0xff pattern:$0x75316420]  ;;  %v207_v4 = vld.sshfl [vmem:[#allocation1 + $0x8] sm:$0xff pattern:$0x75316420] }
  0x2b   : > { %v211_v5 = vsel %vm210_vm1, %v206_v3, 0.0  ;;  %v212_v6 = vsel %vm210_vm1, %v207_v4, 0.0  ;;  %223 = vst [vmem:[#allocation1] ss:$2 sm:$0xff] %v221_v2 }
  0x2c   : > { %v213_v7 = vadd.f32 %v212_v6, %v211_v5 }
  0x2e   : > { %214 = vadd.xlane.f32.xlu0 %v213_v7 }
  0x32   : > { %v224_v8 = vld.sshfl [vmem:[#allocation1] sm:$0xff pattern:$0x75316420]  ;;  %v225_v9 = vld.sshfl [vmem:[#allocation1 + $0x8] sm:$0xff pattern:$0x75316420] }
  0x33   : > { %v228_v10 = vsel %vm210_vm1, %v224_v8, 0.0  ;;  %v229_v11 = vsel %vm210_vm1, %v225_v9, 0.0 }
  0x34   : > { %v230_v12 = vadd.f32 %v229_v11, %v228_v10 }
  0x36   : > { %231 = vadd.xlane.f32.xlu0 %v230_v12 }
  0xa1   : > { %v215_v14 = vpop.xlane.xlu0 %214 }
  0xa2   : > { %v216_v15 = vadd.f32 %v215_v14, %v203_v13 }
  0xa4   : > { %218 = vst.msk [vmem:[#allocation2] sm:$0xf] %vm217_vm2, %v216_v15 }
  0xa8   : > { %239 = sbr.rel (!%p235_p0) target bundleno = 211 (0xd3), region = 44 }
  0xa9   : > { %v232_v17 = vpop.xlane.xlu0 %231 }
  0xaa   : > { %v233_v18 = vadd.f32 %v232_v17, %v220_v16 }
  0xab   : > { %v240_v19 = vld [vmem:[#allocation2] sm:$0xf] (%p235_p0) }
  0xac   : > { %234 = vst.msk [vmem:[#allocation2 + $0x4] sm:$0xf] %vm217_vm2, %v233_v18  ;;  %v241_v21 = vmul.f32 (%p235_p0), 0.001953125, %v240_v19 }
  0xae   : > { %v244_v23 = vmul.f32 %v241_v21, %v241_v21 }
  0xb3   : > { %v242_v20 = vld [vmem:[#allocation2 + $0x4] sm:$0xf] }
  0xb4   : > { %v243_v22 = vmul.f32 0.001953125, %v242_v20 }
  0xb6   : > { %v245_v24 = vsub.f32 %v243_v22, %v244_v23 }
  0xb8   : > { %v246_v25 = vadd.f32 1e-05, %v245_v24 }
  0xba   : > { %388 = vrsqrt.f32 %v246_v25  ;;  %vm253_vm3 = vweird.f32 %v246_v25 }
  0xc0   : > { %v389_v26 = vpop.eup %388 }
  0xc1   : > { %v248_v27 = vmul.f32 %v389_v26, %v246_v25  ;;  %vm254_vm4 = vweird.f32 %v389_v26 }
  0xc2   : > { %vm255_vm5 = vmor %vm253_vm3, %vm254_vm4 }
  0xc3   : > { %v249_v28 = vmul.f32 %v389_v26, %v248_v27 }
  0xc5   : > { %v250_v29 = vmul.f32 0.5, %v249_v28 }
  0xc7   : > { %v251_v30 = vsub.f32 1.5, %v250_v29 }
  0xc9   : > { %v252_v31 = vmul.f32 %v389_v26, %v251_v30 }
  0xcb   : > { %v256_v33 = vsel %vm255_vm5, %v389_v26, %v252_v31 }
  0xcc   : > { %v258_v34 = vmul.f32 %v257_v32, %v256_v33 }
  0xce   : > { %259 = vst.msk [vmem:[%s599_s3] sm:$0xf] %vm217_vm2, %v258_v34  ;;  %v261_v36 = vmul.f32 %v258_v34, %v241_v21 }
  0xd0   : > { %v262_v37 = vsub.f32 %v260_v35, %v261_v36 }
  0xd2   : > { %326 = vst.msk [vmem:[%s599_s3 + $0x4] sm:$0xf] %vm217_vm2, %v262_v37 }
  0xd3 PF: > { %s16_s17 = sadd.s32 1, %s470_s17   ;;  %s602_s12 = smov %s454_s13 }
  0xd4   : > { %p13_p1 = scmp.ge.s32.totalorder %s16_s17, 4   ;;  %s603_s13 = smov %s458_s14 }
  0xd5   : > { %s604_s14 = smov %s542_s24  ;;  %s605_s15 = smov %s466_s16 }
  0xd6   : > { %s606_s16 = smov %s608_s19  ;;  %15 = sbr.rel (!%p13_p1) target bundleno = 4 (0x4), region = 78 }
  0xdb   :  { %276 = vsyncpa [#allocation4], 1 }
  0xdc   :  { %278 = vsyncpa [#allocation4 + $0x1], 1 }

</bundles_post_ra>
